<compile_context>
chip_gen: v6e
topology: v6e:2x2x1
jax: 0.10.0
libtpu: 0.0.40
codegen_flags: <defaults>
</compile_context>

<pallas_src>
import math

import jax
import jax.numpy as jnp
from jax.experimental import pallas as pl
from jax.experimental.pallas import tpu as pltpu

_TORCH_PI = 3.1415926536                      # matches the module's torch_PI
_K0 = math.sqrt(2.0 / _TORCH_PI)              # sqrt(2/pi)
_K1 = 0.044715 * _K0                          # folded at trace time

_LANE = 128                                   # vreg lane width (last dim)
_SUBLANE = 8                                  # f32 sublane granularity
_MIB = 1024 * 1024


def _gelu_kernel(x_ref, o_ref):
    # Compute in f32 on the VPU; tanh goes to the EUP (its own VLIW slot, so
    # it is effectively free here). The polynomial is written as
    # x * (K0 + K1*x^2) to shave a VALU mul per element -- VALU is the first
    # slot to saturate on v7x; on v5e/v6e the kernel is purely HBM-bound so
    # the change is neutral.
    x = x_ref[...].astype(jnp.float32)
    inner = x * (_K0 + _K1 * (x * x))
    t = jnp.tanh(inner)
    o_ref[...] = (x * (0.5 + 0.5 * t)).astype(o_ref.dtype)
    # NOTE: on a ragged last block the out-of-bounds VMEM rows hold
    # unspecified data; tanh of that data is finite and the rows are masked
    # on store, so this is safe for an elementwise op.


def _tpu_generation():
    """Return (vmem_capacity_bytes, assumed TensorCores per chip)."""
    try:
        vmem = int(pltpu.get_tpu_info().vmem_capacity_bytes)
    except Exception:
        vmem = 64 * _MIB                      # conservative fallback: assume v7x
    # v7x: 64 MiB VMEM per TC, 2 TCs/chip. v5e/v6e: 128 MiB VMEM, 1 TC.
    cores = 2 if vmem <= 64 * _MIB else 1
    return vmem, cores


def _choose_block_rows(rows, target_rows, num_cores):
    """Block row count: <= target, multiple of 8 (or == rows), and an even,
    balanced number of blocks across TensorCores (avoids a tiny tail block)."""
    groups = max(num_cores, 1)
    if rows <= 2 * _SUBLANE * groups:         # tiny input: one full block
        return rows
    per_core = pl.cdiv(rows, groups)
    blocks_per_core = pl.cdiv(per_core, target_rows)
    n_blocks = groups * blocks_per_core
    br = pl.cdiv(pl.cdiv(rows, n_blocks), _SUBLANE) * _SUBLANE
    return min(br, rows)


def my_gelu(x, *, block_rows=None, donate_input=False):
    """Tanh-approx GELU (MyGELU.forward). Works for any shape / float dtype."""
    orig_shape = x.shape
    orig_dtype = x.dtype
    assert jnp.issubdtype(orig_dtype, jnp.floating), "MyGELU expects float input"
    n = x.size
    itemsize = jnp.dtype(orig_dtype).itemsize

    # Pad the flat length only to lane (128) granularity. Any n % 128 == 0
    # size round-trips as a free reshape of a contiguous array (no pad, no
    # trailing slice, no extra HBM passes). The (8,128) rule applies to the
    # BlockSpec, not the array, so rows % 8 != 0 is fine (masked last block).
    n_pad = pl.cdiv(n, _LANE) * _LANE
    x_flat = jnp.ravel(x)
    if n_pad != n:
        x_flat = jnp.pad(x_flat, (0, n_pad - n))
    rows = n_pad // _LANE
    x2d = x_flat.reshape(rows, _LANE)

    vmem_bytes, num_cores = _tpu_generation()
    if vmem_bytes > 64 * _MIB:
        # v5e / v6e: 128 MiB VMEM -> 16 MiB blocks (~64 MiB double-buffered).
        target_block_bytes = 16 * _MIB
        vmem_limit = 96 * _MIB
    else:
        # v7x: 64 MiB VMEM -> 8 MiB blocks (~32 MiB double-buffered).
        target_block_bytes = 8 * _MIB
        vmem_limit = 48 * _MIB

    if block_rows is None:
        target_rows = max(_SUBLANE, target_block_bytes // (_LANE * itemsize))
        block_rows = _choose_block_rows(rows, target_rows, num_cores)
    else:
        block_rows = min(block_rows, rows)
        if block_rows < rows:                 # must be a multiple of 8 unless full
            block_rows = pl.cdiv(block_rows, _SUBLANE) * _SUBLANE

    grid = (pl.cdiv(rows, block_rows),)

    cost = pl.CostEstimate(
        flops=7 * n,
        transcendentals=n,
        bytes_accessed=2 * n * itemsize,
    )

    out2d = pl.pallas_call(
        _gelu_kernel,
        out_shape=jax.ShapeDtypeStruct((rows, _LANE), orig_dtype),
        grid_spec=pltpu.PrefetchScalarGridSpec(
            num_scalar_prefetch=0,
            grid=grid,
            in_specs=[pl.BlockSpec((block_rows, _LANE), lambda i: (i, 0))],
            out_specs=pl.BlockSpec((block_rows, _LANE), lambda i: (i, 0)),
        ),
        compiler_params=pltpu.CompilerParams(
            # "parallel" lets the grid shard across v7x's two TensorCores.
            dimension_semantics=("parallel",),
            vmem_limit_bytes=vmem_limit,
        ),
        cost_estimate=cost,
        # Optional in-place update when the caller donates x (avoids doubling
        # peak HBM footprint); only valid on the pad-free path.
        input_output_aliases=({0: 0} if (donate_input and n_pad == n) else {}),
    )(x2d)

    if n_pad != n:
        return out2d.reshape(-1)[:n].reshape(orig_shape)
    return out2d.reshape(orig_shape)


def _ref_gelu(x):
    # Straightforward transcription of MyGELU.forward.
    return 0.5 * x * (
        1.0 + jnp.tanh(math.sqrt(2.0 / _TORCH_PI) * (x + 0.044715 * jnp.power(x, 3)))
    )


if __name__ == "__main__":
    key = jax.random.PRNGKey(0)

    # 1) Small NCHW-like activation tensor (aligned: 2048 elems, zero-copy path).
    x = jax.random.normal(key, (2, 4, 16, 16), dtype=jnp.float32)
    y = jax.block_until_ready(my_gelu(x))
    y_ref = _ref_gelu(x)
    assert y.shape == x.shape and y.dtype == x.dtype
    assert jnp.allclose(y, y_ref, atol=1e-5, rtol=1e-5), "mismatch (aligned)"

    # 2) Size not divisible by 128 exercises the pad + trailing-slice path.
    x2 = jax.random.normal(jax.random.PRNGKey(1), (3, 5, 7), dtype=jnp.float32)
    y2 = jax.block_until_ready(my_gelu(x2))
    y2_ref = _ref_gelu(x2)
    assert y2.shape == x2.shape and y2.dtype == x2.dtype
    assert jnp.allclose(y2, y2_ref, atol=1e-5, rtol=1e-5), "mismatch (ragged pad)"

    # 3) rows % 8 != 0 with multi-block grid exercises masked ragged blocks
    #    (no padding: 50*128 elements is lane-aligned).
    x3 = jax.random.normal(jax.random.PRNGKey(2), (50, 128), dtype=jnp.float32)
    y3 = jax.block_until_ready(my_gelu(x3, block_rows=16))
    y3_ref = _ref_gelu(x3)
    assert y3.shape == x3.shape and y3.dtype == x3.dtype
    assert jnp.allclose(y3, y3_ref, atol=1e-5, rtol=1e-5), "mismatch (masked block)"

    print("KERNEL_OK")
</pallas_src>

<mosaic_0001>
module attributes {stable_mosaic.version = 11 : i64} {
  func.func @_gelu_kernel(%arg0: i32, %arg1: memref<16x128xf32, #tpu.memory_space<vmem>>, %arg2: memref<16x128xf32, #tpu.memory_space<vmem>>) attributes {dimension_semantics = [#tpu.dimension_semantics<parallel>], iteration_bounds = array<i64: 1>, scalar_prefetch = 0 : i64, scratch_operands = 0 : i64, tpu.core_type = #tpu.core_type<tc>, window_params = [{transform_indices = @transform_0, window_bounds = array<i64: 16, 128>}, {transform_indices = @transform_1, window_bounds = array<i64: 16, 128>}]} {
    %c0 = arith.constant 0 : index
    %c0_0 = arith.constant 0 : index
    %0 = vector.load %arg1[%c0, %c0_0] : memref<16x128xf32, #tpu.memory_space<vmem>>, vector<16x128xf32>
    %1 = arith.mulf %0, %0 : vector<16x128xf32>
    %cst = arith.constant 0.0356774069 : f32
    %2 = vector.broadcast %cst : f32 to vector<16x128xf32>
    %3 = arith.mulf %2, %1 : vector<16x128xf32>
    %cst_1 = arith.constant 0.797884583 : f32
    %4 = vector.broadcast %cst_1 : f32 to vector<16x128xf32>
    %5 = arith.addf %4, %3 : vector<16x128xf32>
    %6 = arith.mulf %0, %5 : vector<16x128xf32>
    %7 = math.tanh %6 : vector<16x128xf32>
    %cst_2 = arith.constant 5.000000e-01 : f32
    %8 = vector.broadcast %cst_2 : f32 to vector<16x128xf32>
    %9 = arith.mulf %8, %7 : vector<16x128xf32>
    %cst_3 = arith.constant 5.000000e-01 : f32
    %10 = vector.broadcast %cst_3 : f32 to vector<16x128xf32>
    %11 = arith.addf %10, %9 : vector<16x128xf32>
    %12 = arith.mulf %0, %11 : vector<16x128xf32>
    %c0_4 = arith.constant 0 : index
    %c0_5 = arith.constant 0 : index
    %13 = vector.load %arg2[%c0_4, %c0_5] : memref<16x128xf32, #tpu.memory_space<vmem>>, vector<16x128xf32>
    tpu.vector_store %arg2[%c0_4, %c0_5], %12 {strides = array<i32>} : memref<16x128xf32, #tpu.memory_space<vmem>>, vector<16x128xf32>,
    return
  }
  func.func @transform_0(%arg0: i32) -> (i32, i32) {
    %c0_i32 = arith.constant 0 : i32
    %c0_i32_0 = arith.constant 0 : i32
    return %arg0, %c0_i32 : i32, i32
  }
  func.func @transform_1(%arg0: i32) -> (i32, i32) {
    %c0_i32 = arith.constant 0 : i32
    %c0_i32_0 = arith.constant 0 : i32
    return %arg0, %c0_i32 : i32, i32
  }
}

</mosaic_0001>

<bundles_post_ra>
// kernel: tpu_custom_call.1
= control target key start
LH: loop header
LB: loop body
LE: loop exit
PB: predicated region body
PF: predicated region fallthrough
CT: control target
= control target key end

     0   :  { %6 = vsyncpa [#allocation3], 0  ;;  %s138_s0 = inlined_call_operand.hbm [shape: f32[16,128], index: 0, kind: input, shape index: {}]   ;;  %s139_s1 = inlined_call_operand.hbm [shape: f32[16,128], index: 1, kind: output, shape index: {}]  }
   0x1   :  { %7 = vsyncpa [#allocation4], 0  ;;  %s112_s6 = smov [#allocation2]  }
   0x2   :  { %s13_s7 = sshll.u32 %s112_s6, 4  ;;  %s14_s7 = int_to_ptr.vmem [resolvable:$true] %s13_s7 }
   0x3   :  { %s76_s8 = scalar_lea.vmem %s14_s7, 256  ;;  %p81_p1 = scmp.lt.s32.totalorder %s14_s7, %s14_s7 }
   0x4   :  { %p77_p0 = scmp.ne.s32.totalorder %s14_s7, %s76_s8  ;;  %p82_p2 = scmp.lt.s32.totalorder %s76_s8, %s76_s8 }
   0x6   :  { %p83_p3 = por %p82_p2, %p81_p1 }
   0x8   :  { %p84_p4 = pnand %p83_p3, %p77_p0 }
   0xa   :  { %87 = shalt.err (!%p84_p4)
}
   0xb   :  { %s113_s9 = smov 128   ;;  %s114_s10 = smov 8  }
   0xc   :  { %19 = dma.hbm_to_vmem [thread:$0]  %s138_s0, 256, %s14_s7, [#allocation3], %s113_s9, %s113_s9, %s114_s10  }
   0xd   :  { %108 = dma.done.wait [#allocation3], 256  }
   0xe   :  { %109 = vsyncadd [#allocation3], 4294967040  ;;  %v23_v0 = vld [vmem:[#allocation2] sm:$0xff]  ;;  %v24_v1 = vld [vmem:[#allocation2 + $0x8] sm:$0xff]  ;;  %s115_s0 = smov [#allocation5]  }
   0xf   :  { %v25_v2 = vmul.f32 %v23_v0, %v23_v0  ;;  %v26_v3 = vmul.f32 %v24_v1, %v24_v1  ;;  %s48_s13 = sshll.u32 %s115_s0, 4  ;;  %s49_s13 = int_to_ptr.vmem [resolvable:$true] %s48_s13 }
  0x10   :  { %s88_s14 = scalar_lea.vmem %s49_s13, 256  ;;  %p93_p6 = scmp.lt.s32.totalorder %s49_s13, %s49_s13 }
  0x11   :  { %v27_v4 = vmul.f32 0.035677407, %v25_v2  ;;  %v28_v5 = vmul.f32 0.035677407, %v26_v3  ;;  %p89_p5 = scmp.ne.s32.totalorder %s49_s13, %s88_s14  ;;  %p94_p7 = scmp.lt.s32.totalorder %s88_s14, %s88_s14 }
  0x13   :  { %v29_v6 = vadd.f32 0.7978846, %v27_v4  ;;  %v30_v7 = vadd.f32 0.7978846, %v28_v5  ;;  %p95_p8 = por %p94_p7, %p93_p6 }
  0x15   :  { %v31_v8 = vmul.f32 %v29_v6, %v23_v0  ;;  %v32_v9 = vmul.f32 %v30_v7, %v24_v1  ;;  %p96_p9 = pnand %p95_p8, %p89_p5 }
  0x17   :  { %64 = vtanh.f32 %v31_v8 }
  0x18   :  { %66 = vtanh.f32 %v32_v9 }
  0x24   :  { %v65_v10 = vpop.eup %64 }
  0x25   :  { %v67_v11 = vpop.eup %66  ;;  %v35_v12 = vmul.f32 0.5, %v65_v10 }
  0x26   :  { %v36_v13 = vmul.f32 0.5, %v67_v11 }
  0x27   :  { %v37_v14 = vadd.f32 0.5, %v35_v12 }
  0x28   :  { %v38_v15 = vadd.f32 0.5, %v36_v13 }
  0x29   :  { %v39_v16 = vmul.f32 %v37_v14, %v23_v0 }
  0x2a   :  { %v40_v17 = vmul.f32 %v38_v15, %v24_v1 }
  0x2b   :  { %41 = vst [vmem:[#allocation5] sm:$0xff] %v39_v16 }
  0x2c   :  { %42 = vst [vmem:[#allocation5 + $0x8] sm:$0xff] %v40_v17 }
  0x2d   :  { %99 = shalt.err (!%p96_p9)
}
  0x2e   :  { %54 = dma.vmem_to_hbm [thread:$0]  %s49_s13, 256, %s139_s1, [#allocation4], %s113_s9, %s113_s9, %s114_s10  }
  0x2f   :  { %110 = dma.done.wait [#allocation4], 256  }
  0x30   :  { %111 = vsyncadd [#allocation4], 4294967040 }
  0x31   :  { %58 = vsyncpa [#allocation3], 1 }
  0x32   :  { %59 = vsyncpa [#allocation4], 1 }

</bundles_post_ra>
